<compile_context>
chip_gen: v7x
topology: tpu7x:2x2x1
jax: 0.10.0
libtpu: 0.0.40
codegen_flags: <defaults>
</compile_context>

<pallas_src>
import functools
import math

import jax
import jax.numpy as jnp
from jax.experimental import pallas as pl
from jax.experimental.pallas import tpu as pltpu

_NEG_LARGE = -1e30  # plain Python float -> embedded literal, NOT a captured constant


def _round_up(v, m):
    return ((v + m - 1) // m) * m


def _topk_gate_kernel(x_ref, w_ref, b_ref, o_ref, *, topk: int, slab: int):
    """Fused gate for one row-tile.

    x_ref: (TILE_M, c_in)   VMEM
    w_ref: (c_in, n_exp)    VMEM (resident, block index constant)
    b_ref: (1, n_exp)       VMEM
    o_ref: (TILE_M, n_exp)  VMEM (lane width == real n_exp, no padding)
    """
    tile_m = x_ref.shape[0]
    n_exp = o_ref.shape[1]
    n_slabs = tile_m // slab
    k_eff = min(topk, n_exp)

    w = w_ref[...]
    bias = b_ref[...].astype(jnp.float32)
    col = jax.lax.broadcasted_iota(jnp.int32, (slab, n_exp), 1)

    @pl.loop(0, n_slabs)
    def _(s):
        r0 = pl.multiple_of(s * slab, slab)
        x = x_ref[pl.ds(r0, slab), :]

        # scores = x @ W + b   (f32 accumulation on the MXU)
        scores = jnp.dot(x, w, preferred_element_type=jnp.float32) + bias

        # softmax over the expert axis (all columns are real -> no masking needed)
        row_max = jnp.max(scores, axis=-1, keepdims=True)
        e = jnp.exp(scores - row_max)
        probs = e / jnp.sum(e, axis=-1, keepdims=True)

        # iterative top-k (k is a small static int); ties broken by lowest index so
        # at most k entries survive — matches torch.topk + scatter_(src=values).
        remaining = probs
        out = jnp.zeros((slab, n_exp), jnp.float32)
        for _ in range(k_eff):
            cur_max = jnp.max(remaining, axis=-1, keepdims=True)
            is_max = remaining == cur_max
            first_idx = jnp.min(jnp.where(is_max, col, n_exp), axis=-1, keepdims=True)
            pick = col == first_idx
            out = jnp.where(pick, probs, out)
            remaining = jnp.where(pick, _NEG_LARGE, remaining)

        o_ref[pl.ds(r0, slab), :] = out.astype(o_ref.dtype)


def _choose_tiles(m, c_in, itemsize, tile_m_hint, slab_hint):
    """Row tile (multiple of 8) + epilogue slab; tile % slab == 0."""
    # cap the (double-buffered) x block around 8 MiB -> safe inside v7x scoped VMEM
    cap_rows = max(8, ((8 * 1024 * 1024) // max(1, 2 * c_in * itemsize)) // 8 * 8)
    tile = min(tile_m_hint, cap_rows, _round_up(m, 8))
    if m > 8:
        # keep >= 2 grid steps so the "parallel" axis can use both v7x TensorCores
        tile = min(tile, _round_up(pl.cdiv(m, 2), 8))
    tile = max(8, (tile // 8) * 8)
    if tile >= slab_hint:
        slab = slab_hint
        tile = (tile // slab) * slab
    else:
        slab = tile
    return tile, slab


def topk_gate_forward(x, w, b, topk, *, tile_m=1024, slab=64):
    """x: (..., c_in); w: (c_in, n_exp) (PyTorch weight transposed); b: (n_exp,)."""
    lead = x.shape[:-1]
    c_in = x.shape[-1]
    n_exp = w.shape[1]
    m = int(math.prod(lead)) if lead else 1

    x2d = x.reshape(m, c_in)                       # free (metadata only)
    w2 = w if w.dtype == x2d.dtype else w.astype(x2d.dtype)   # tiny
    b2 = b.astype(jnp.float32).reshape(1, n_exp)               # tiny

    tile, slab_eff = _choose_tiles(m, c_in, jnp.dtype(x2d.dtype).itemsize,
                                   tile_m, slab)
    grid = (pl.cdiv(m, tile),)

    kernel = functools.partial(_topk_gate_kernel, topk=topk, slab=slab_eff)
    out = pl.pallas_call(
        kernel,
        out_shape=jax.ShapeDtypeStruct((m, n_exp), x2d.dtype),
        grid_spec=pl.GridSpec(
            grid=grid,
            in_specs=[
                pl.BlockSpec((tile, c_in), lambda i: (i, 0)),
                pl.BlockSpec((c_in, n_exp), lambda i: (0, 0)),
                pl.BlockSpec((1, n_exp), lambda i: (0, 0)),
            ],
            out_specs=pl.BlockSpec((tile, n_exp), lambda i: (i, 0)),
        ),
        compiler_params=pltpu.CompilerParams(
            dimension_semantics=("parallel",),
            vmem_limit_bytes=32 * 1024 * 1024,
        ),
    )(x2d, w2, b2)

    return out.reshape(*lead, n_exp)


def init_topk_gate_params(key, c_in, n_exp):
    """Matches nn.Linear default init; weight stored as (c_in, n_exp)."""
    kw, kb = jax.random.split(key)
    bound = 1.0 / math.sqrt(c_in)
    w = jax.random.uniform(kw, (c_in, n_exp), jnp.float32, -bound, bound)
    b = jax.random.uniform(kb, (n_exp,), jnp.float32, -bound, bound)
    return w, b


def topk_gate_reference(x, w, b, topk):
    """Plain-JAX reference of TopkGate.forward."""
    scores = jnp.dot(x, w, precision=jax.lax.Precision.HIGHEST) + b
    probs = jax.nn.softmax(scores, axis=-1)
    _, idx = jax.lax.top_k(probs, topk)
    mask = jnp.sum(jax.nn.one_hot(idx, probs.shape[-1], dtype=probs.dtype), axis=-2)
    return probs * mask


if __name__ == "__main__":
    batch, seq, c_in, n_exp, topk = 2, 8, 32, 8, 2

    key = jax.random.PRNGKey(0)
    key, kx = jax.random.split(key)
    x = jax.random.normal(kx, (batch, seq, c_in), jnp.float32)
    w, b = init_topk_gate_params(key, c_in, n_exp)

    y = topk_gate_forward(x, w, b, topk)
    y = jax.block_until_ready(y)

    y_ref = topk_gate_reference(x, w, b, topk)
    assert y.shape == (batch, seq, n_exp), y.shape
    assert jnp.allclose(y, y_ref, atol=1e-5, rtol=1e-4), "mismatch vs reference"
    # every row keeps at most topk nonzero (softmax) entries
    assert int(jnp.max(jnp.sum(y > 0, axis=-1))) <= topk

    print("KERNEL_OK")
</pallas_src>

<mosaic_0001>
module attributes {stable_mosaic.version = 11 : i64} {
  func.func @_topk_gate_kernel(%arg0: i32, %arg1: memref<8x32xf32, #tpu.memory_space<vmem>>, %arg2: memref<32x8xf32, #tpu.memory_space<vmem>>, %arg3: memref<1x8xf32, #tpu.memory_space<vmem>>, %arg4: memref<8x8xf32, #tpu.memory_space<vmem>>) attributes {dimension_semantics = [#tpu.dimension_semantics<parallel>], iteration_bounds = array<i64: 2>, scalar_prefetch = 0 : i64, scratch_operands = 0 : i64, tpu.core_type = #tpu.core_type<tc>, window_params = [{transform_indices = @transform_0, window_bounds = array<i64: 8, 32>}, {pipeline_mode = #tpu.pipeline_mode<synchronous>, transform_indices = @transform_1, window_bounds = array<i64: 32, 8>}, {pipeline_mode = #tpu.pipeline_mode<synchronous>, transform_indices = @transform_2, window_bounds = array<i64: 1, 8>}, {transform_indices = @transform_3, window_bounds = array<i64: 8, 8>}]} {
    %c0 = arith.constant 0 : index
    %c0_0 = arith.constant 0 : index
    %0 = vector.load %arg2[%c0, %c0_0] : memref<32x8xf32, #tpu.memory_space<vmem>>, vector<32x8xf32>
    %c0_1 = arith.constant 0 : index
    %c0_2 = arith.constant 0 : index
    %1 = vector.load %arg3[%c0_1, %c0_2] : memref<1x8xf32, #tpu.memory_space<vmem>>, vector<1x8xf32>
    %2 = tpu.iota {dimensions = array<i32: 1>} : vector<8x8xi32>
    %c0_i32 = arith.constant 0 : i32
    %c1_i32 = arith.constant 1 : i32
    %3 = arith.muli %c0_i32, %c1_i32 : i32
    %c0_i32_3 = arith.constant 0 : i32
    %4 = arith.addi %c0_i32_3, %3 : i32
    %c8_i32 = arith.constant 8 : i32
    %5 = arith.muli %4, %c8_i32 : i32
    %6 = tpu.assume_multiple %5, 8 : i32
    %7 = arith.index_cast %6 : i32 to index
    %c0_4 = arith.constant 0 : index
    %8 = vector.load %arg1[%7, %c0_4] : memref<8x32xf32, #tpu.memory_space<vmem>>, vector<8x32xf32>
    %cst = arith.constant dense<0.000000e+00> : vector<8x8xf32>
    %9 = tpu.matmul %8, %0, %cst {dimension_numbers = #tpu.dot_dimension_numbers<[1], [0], [0], [1], [0, 0, 1, 1], [], []>} : vector<8x32xf32>, vector<32x8xf32>, vector<8x8xf32> -> vector<8x8xf32>
    %10 = vector.broadcast %1 : vector<1x8xf32> to vector<8x8xf32>
    %11 = arith.addf %9, %10 : vector<8x8xf32>
    %cst_5 = arith.constant dense<0xFF800000> : vector<8xf32>
    %12 = vector.multi_reduction <maximumf>, %11, %cst_5 [1] : vector<8x8xf32> to vector<8xf32>
    %13 = vector.shape_cast %12 : vector<8xf32> to vector<8x1xf32>
    %14 = vector.broadcast %13 : vector<8x1xf32> to vector<8x8xf32>
    %15 = arith.subf %11, %14 : vector<8x8xf32>
    %16 = math.exp %15 : vector<8x8xf32>
    %cst_6 = arith.constant dense<0.000000e+00> : vector<8xf32>
    %17 = vector.multi_reduction <add>, %16, %cst_6 [1] : vector<8x8xf32> to vector<8xf32>
    %18 = vector.shape_cast %17 : vector<8xf32> to vector<8x1xf32>
    %19 = vector.broadcast %18 : vector<8x1xf32> to vector<8x8xf32>
    %20 = arith.divf %16, %19 : vector<8x8xf32>
    %cst_7 = arith.constant 0.000000e+00 : f32
    %21 = vector.broadcast %cst_7 : f32 to vector<8x8xf32>
    %cst_8 = arith.constant dense<0xFF800000> : vector<8xf32>
    %22 = vector.multi_reduction <maximumf>, %20, %cst_8 [1] : vector<8x8xf32> to vector<8xf32>
    %23 = vector.shape_cast %22 : vector<8xf32> to vector<8x1xf32>
    %24 = vector.broadcast %23 : vector<8x1xf32> to vector<8x8xf32>
    %25 = arith.cmpf oeq, %20, %24 : vector<8x8xf32>
    %c8_i32_9 = arith.constant 8 : i32
    %26 = vector.broadcast %c8_i32_9 : i32 to vector<8x8xi32>
    %27 = arith.select %25, %2, %26 : vector<8x8xi1>, vector<8x8xi32>
    %cst_10 = arith.constant dense<2147483647> : vector<8xi32>
    %28 = vector.multi_reduction <minsi>, %27, %cst_10 [1] : vector<8x8xi32> to vector<8xi32>
    %29 = vector.shape_cast %28 : vector<8xi32> to vector<8x1xi32>
    %30 = vector.broadcast %29 : vector<8x1xi32> to vector<8x8xi32>
    %31 = arith.cmpi eq, %2, %30 : vector<8x8xi32>
    %32 = arith.select %31, %20, %21 : vector<8x8xi1>, vector<8x8xf32>
    %cst_11 = arith.constant -1.000000e+30 : f32
    %33 = vector.broadcast %cst_11 : f32 to vector<8x8xf32>
    %34 = arith.select %31, %33, %20 : vector<8x8xi1>, vector<8x8xf32>
    %cst_12 = arith.constant dense<0xFF800000> : vector<8xf32>
    %35 = vector.multi_reduction <maximumf>, %34, %cst_12 [1] : vector<8x8xf32> to vector<8xf32>
    %36 = vector.shape_cast %35 : vector<8xf32> to vector<8x1xf32>
    %37 = vector.broadcast %36 : vector<8x1xf32> to vector<8x8xf32>
    %38 = arith.cmpf oeq, %34, %37 : vector<8x8xf32>
    %c8_i32_13 = arith.constant 8 : i32
    %39 = vector.broadcast %c8_i32_13 : i32 to vector<8x8xi32>
    %40 = arith.select %38, %2, %39 : vector<8x8xi1>, vector<8x8xi32>
    %cst_14 = arith.constant dense<2147483647> : vector<8xi32>
    %41 = vector.multi_reduction <minsi>, %40, %cst_14 [1] : vector<8x8xi32> to vector<8xi32>
    %42 = vector.shape_cast %41 : vector<8xi32> to vector<8x1xi32>
    %43 = vector.broadcast %42 : vector<8x1xi32> to vector<8x8xi32>
    %44 = arith.cmpi eq, %2, %43 : vector<8x8xi32>
    %45 = arith.select %44, %20, %32 : vector<8x8xi1>, vector<8x8xf32>
    %46 = arith.index_cast %6 : i32 to index
    %c0_15 = arith.constant 0 : index
    %47 = vector.load %arg4[%46, %c0_15] : memref<8x8xf32, #tpu.memory_space<vmem>>, vector<8x8xf32>
    tpu.vector_store %arg4[%46, %c0_15], %45 {strides = array<i32>} : memref<8x8xf32, #tpu.memory_space<vmem>>, vector<8x8xf32>,
    %c1_i32_16 = arith.constant 1 : i32
    return
  }
  func.func @transform_0(%arg0: i32) -> (i32, i32) {
    %c0_i32 = arith.constant 0 : i32
    %c0_i32_0 = arith.constant 0 : i32
    return %arg0, %c0_i32 : i32, i32
  }
  func.func @transform_1(%arg0: i32) -> (i32, i32) {
    %c0_i32 = arith.constant 0 : i32
    %c0_i32_0 = arith.constant 0 : i32
    %c0_i32_1 = arith.constant 0 : i32
    return %c0_i32, %c0_i32_0 : i32, i32
  }
  func.func @transform_2(%arg0: i32) -> (i32, i32) {
    %c0_i32 = arith.constant 0 : i32
    %c0_i32_0 = arith.constant 0 : i32
    %c0_i32_1 = arith.constant 0 : i32
    return %c0_i32, %c0_i32_0 : i32, i32
  }
  func.func @transform_3(%arg0: i32) -> (i32, i32) {
    %c0_i32 = arith.constant 0 : i32
    %c0_i32_0 = arith.constant 0 : i32
    return %arg0, %c0_i32 : i32, i32
  }
}

</mosaic_0001>

<bundles_post_ra>
// kernel: tpu_custom_call.1
= control target key start
LH: loop header
LB: loop body
LE: loop exit
PB: predicated region body
PF: predicated region fallthrough
CT: control target
= control target key end

     0   :  { %s444_s12 = smov 0   ;;  %s492_s0 = inlined_call_operand.vmem [shape: f32[16,32], index: 0, kind: input, shape index: {}]   ;;  %s493_s1 = inlined_call_operand.vmem [shape: f32[32,8], index: 1, kind: input, shape index: {}]   ;;  %s494_s2 = inlined_call_operand.vmem [shape: f32[1,8], index: 2, kind: input, shape index: {}]   ;;  %s495_s3 = inlined_call_operand.vmem [shape: f32[16,8], index: 3, kind: output, shape index: {}]  }
   0x1 LB: > { %s365_s13 = sadd.s32 4294967295, %s419_s12   ;;  %p369_p0 = scmp.ge.s32.totalorder %s419_s12, 1  ;;  %s419_s12 = sphi %s444_s12, %s13_s12  }
   0x2   : > { %p136_p1 = scmp.lt.s32.totalorder %s419_s12, 3 }
   0x4   : > { %p137_p2 = pnand %p369_p0, %p136_p1 }
   0x5   : > { %v166_v0 = vld [vmem:[%s493_s1] sm:$0xff] (!%p137_p2)  ;;  %v167_v1 = vld [vmem:[%s493_s1 + $0x8] sm:$0xff] (!%p137_p2)  ;;  %v168_v2 = vld [vmem:[%s493_s1 + $0x10] sm:$0xff] (!%p137_p2)  ;;  %v421_v3 = vmov (!%p137_p2), 0.0|0.0   ;;  %vm422_vm0 = vmmov (!%p137_p2), 0   ;;  %v423_v6 = vmov (!%p137_p2), 0.0   ;;  %v171_v23 = vlaneseq (!%p137_p2) }
   0x6   : > { %140 = sbr.rel (%p137_p2) target bundleno = 1430 (0x596), region = 32  ;;  %392 = vmatprep.subr.bf16.mxu0 (!%p137_p2), %v421_v3  ;;  %v393_v4 = vpack.c.bf16 (!%p137_p2), %v167_v1, %v166_v0  ;;  %v169_v5 = vld [vmem:[%s493_s1 + $0x18] sm:$0xff] (!%p137_p2)  ;;  %389 = vmatprep.mubr.msk.f32.mxu0 (!%p137_p2), %vm422_vm0, %v423_v6  ;;  %p158_p3 = scmp.lt.s32.totalorder (!%p137_p2), %s365_s13, 1  ;;  %vm180_vm1 = vcmask (!%p137_p2), 261120   ;;  %v372_v9 = vld [vmem:[%s494_s2] ss:$0 sm:$0xff] (!%p137_p2) }
   0x7   : > { %v396_v7 = vpack.c.bf16 (!%p137_p2), %v169_v5, %v168_v2  ;;  %vm254_vm2 = vcmask (!%p137_p2), 64512   ;;  %v172_v24 = vand.u32 (!%p137_p2), 127, %v171_v23 }
   0x8   : > { %394 = vmatpush3.bf16.msra.mxu0 (!%p137_p2), %v393_v4 }
   0x9   : > { %395 = vmatprep.subr.bf16.mxu0 (!%p137_p2), %v421_v3 }
   0xc   : > { %397 = vmatpush3.bf16.msra.mxu0 (!%p137_p2), %v396_v7 }
   0xd   : > { %s497_s13 = smov (!%p158_p3, %s365_s13), 1 }
   0xe   : > { %s370_s22 = sshll.u32 %s497_s13, 3 }
   0xf   : > { %s161_s25 = scalar_lea.vmem %s492_s0, %s370_s22  ;;  %s165_s30 = scalar_lea.vmem %s495_s3, %s370_s22 }
  0x10   : > { %v173_v8 = vld [vmem:[%s161_s25] sm:$0xff] }
  0x11   : > { %390 = vmatmul.mubr.msk.f32.vlgmr.msra.gmra.mrb[0].mxu0 %vm180_vm1, %v173_v8 }
  0xe4   : > { %v250_v10 = vpop.f32.mrb[0].mxu0 }
  0xe5   : > { %v251_v11 = vadd.f32 %v372_v9, %v250_v10  ;;  %v391_v12 = vpop.f32.mrb[1].mxu0 }
  0xe7   : > { %v255_v13 = vsel %vm254_vm2, %v251_v11, -inf }
  0xe8   : > { %256 = vmax.xlane.f32.xlu0 %v255_v13 }
 0x175   : > { %v257_v14 = vpop.xlane.xlu0 %256 }
 0x176   : > { %v258_v15 = vsub.f32 %v251_v11, %v257_v14 }
 0x178   : > { %v259_v16 = vmul.f32 1.442695, %v258_v15 }
 0x17a   : > { %409 = vpow2.f32 %v259_v16 }
 0x184   : > { %v410_v17 = vpop.eup %409 }
 0x185   : > { %v261_v18 = vsel %vm254_vm2, %v410_v17, 0.0 }
 0x186   : > { %262 = vadd.xlane.f32.xlu0 %v261_v18 }
 0x213   : > { %v263_v19 = vpop.xlane.xlu0 %262 }
 0x214   : > { %411 = vrcp.f32 %v263_v19 }
 0x21e   : > { %v412_v20 = vpop.eup %411 }
 0x21f   : > { %v265_v21 = vmul.f32 %v412_v20, %v410_v17 }
 0x221   : > { %v266_v22 = vsel %vm254_vm2, %v265_v21, -inf }
 0x222   : > { %267 = vmax.xlane.f32.xlu1 %v266_v22 }
 0x2af   : > { %v268_v25 = vpop.xlane.xlu1 %267 }
 0x2b0   : > { %vm269_vm3 = vcmp.eq.f32.partialorder %v265_v21, %v268_v25 }
 0x2b1   : > { %v270_v26 = vsel %vm269_vm3, %v172_v24, 8 }
 0x2b2   : > { %v271_v27 = vsel %vm254_vm2, %v270_v26, 2147483647 }
 0x2b3   : > { %v273_v28 = vshra.s32 %v271_v27, 16  ;;  %v272_v30 = vand.u32 65535, %v271_v27 }
 0x2b5   : > { %v275_v29 = vcvt.s32.f32 %v273_v28  ;;  %v274_v32 = vcvt.s32.f32 %v272_v30 }
 0x2b7   : > { %276 = vmin.xlane.f32.xlu1 %v275_v29 }
 0x344   : > { %v277_v31 = vpop.xlane.xlu1 %276 }
 0x345   : > { %vm278_vm4 = vcmp.eq.f32.partialorder %v275_v29, %v277_v31  ;;  %v283_v34 = vcvt.f32.s32 %v277_v31 }
 0x346   : > { %v279_v33 = vsel %vm278_vm4, %v274_v32, inf }
 0x347   : > { %280 = vmin.xlane.f32.xlu0 %v279_v33  ;;  %v284_v36 = vshll.u32 %v283_v34, 16 }
 0x3d4   : > { %v281_v35 = vpop.xlane.xlu0 %280 }
 0x3d5   : > { %v282_v37 = vcvt.f32.s32 %v281_v35 }
 0x3d7   : > { %v285_v38 = vadd.s32 %v284_v36, %v282_v37 }
 0x3d9   : > { %vm286_vm5 = vcmp.eq.s32.totalorder %v172_v24, %v285_v38 }
 0x3da   : > { %v288_v39 = vsel %vm286_vm5, -1e+30, %v265_v21  ;;  %v287_v55 = vsel %vm286_vm5, %v265_v21, 0.0 }
 0x3db   : > { %v289_v40 = vsel %vm254_vm2, %v288_v39, -inf }
 0x3dc   : > { %290 = vmax.xlane.f32.xlu1 %v289_v40 }
 0x469   : > { %v291_v41 = vpop.xlane.xlu1 %290 }
 0x46a   : > { %vm292_vm6 = vcmp.eq.f32.partialorder %v288_v39, %v291_v41 }
 0x46b   : > { %v293_v42 = vsel %vm292_vm6, %v172_v24, 8 }
 0x46c   : > { %v294_v43 = vsel %vm254_vm2, %v293_v42, 2147483647 }
 0x46d   : > { %v296_v44 = vshra.s32 %v294_v43, 16  ;;  %v295_v46 = vand.u32 65535, %v294_v43 }
 0x46f   : > { %v298_v45 = vcvt.s32.f32 %v296_v44  ;;  %v297_v48 = vcvt.s32.f32 %v295_v46 }
 0x471   : > { %299 = vmin.xlane.f32.xlu0 %v298_v45 }
 0x4fe   : > { %v300_v47 = vpop.xlane.xlu0 %299 }
 0x4ff   : > { %vm301_vm7 = vcmp.eq.f32.partialorder %v298_v45, %v300_v47  ;;  %v306_v50 = vcvt.f32.s32 %v300_v47 }
 0x500   : > { %v302_v49 = vsel %vm301_vm7, %v297_v48, inf }
 0x501   : > { %303 = vmin.xlane.f32.xlu1 %v302_v49  ;;  %v307_v52 = vshll.u32 %v306_v50, 16 }
 0x58e   : > { %v304_v51 = vpop.xlane.xlu1 %303 }
 0x58f   : > { %v305_v53 = vcvt.f32.s32 %v304_v51 }
 0x591   : > { %v308_v54 = vadd.s32 %v307_v52, %v305_v53 }
 0x593   : > { %vm309_vm8 = vcmp.eq.s32.totalorder %v172_v24, %v308_v54 }
 0x594   : > { %v310_v56 = vsel %vm309_vm8, %v265_v21, %v287_v55 }
 0x595   : > { %311 = vst.msk [vmem:[%s165_s30] sm:$0xff] %vm254_vm2, %v310_v56 }
 0x596 PF: > { %s13_s12 = sadd.s32 1, %s419_s12  }
 0x597   : > { %p10_p4 = scmp.ge.s32.totalorder %s13_s12, 4  }
 0x599   :  { %12 = sbr.rel (!%p10_p4) target bundleno = 1 (0x1), region = 62 }

</bundles_post_ra>
